<compile_context>
chip_gen: v5e
topology: v5e:2x2
jax: 0.10.0
libtpu: 0.0.40
codegen_flags: <defaults>
</compile_context>

<pallas_src>
import jax
import jax.numpy as jnp
from jax.experimental import pallas as pl
from jax.experimental.pallas import tpu as pltpu


def patch_embed_kernel(x_ref, w_ref, pos_ref, cls_ref, o_ref):
    # x_ref  : (1, L, K)   flattened RGB patch slices for one batch element
    # w_ref  : (K, F)      backbone projection weight (batch-invariant)
    # pos_ref: (L, F)      positions[1:] + bias (batch-invariant, pre-fused)
    # cls_ref: (1, F)      cls_token + positions[0] (batch-invariant, pre-fused)
    # o_ref  : (1, L+1, F) fused output block: [cls row ; patch embeddings]
    emb = jnp.dot(x_ref[0], w_ref[...], preferred_element_type=jnp.float32)  # (L, F)
    o_ref[0, 0:1, :] = cls_ref[...].astype(o_ref.dtype)
    o_ref[0, 1:, :] = (emb + pos_ref[...]).astype(o_ref.dtype)


def prepare_patch_embed_params(w, b, cls_token, positions):
    """One-time (init-time) parameter packing. NOT part of the forward path."""
    F = w.shape[1]
    w_f32 = w.astype(jnp.float32)                                   # (K, F)
    pos_f32 = positions.astype(jnp.float32)                         # (L+1, F)
    # Fold the backbone bias into the per-row positional embeddings.
    pos_plus_b = pos_f32[1:] + b.reshape(1, F).astype(jnp.float32)  # (L, F)
    # Batch-invariant cls row.
    cls_row = cls_token.reshape(1, F).astype(jnp.float32) + pos_f32[0:1]  # (1, F)
    return w_f32, pos_plus_b, cls_row


def patch_embedding_forward(image, w_f32, pos_plus_b, cls_row):
    """image: (B, N, C, D, H, W) float32; returns (B, L+1, F)."""
    B, N, C, D, H, W = image.shape
    total = N * C * D
    assert total % 3 == 0, "N*C*D must be divisible by 3 (RGB channel regrouping)"
    L = total // 3
    K = 3 * H * W
    F = w_f32.shape[1]

    # einops rearranges from the PyTorch forward (patch_size == 1):
    # 'b n c d h w -> b (n c d) h w' -> 'b (ncd 3) h w -> b ncd 3 h w'
    # -> per batch: l rows of (c h w) — all contiguous row-major reshapes.
    x3d = image.reshape(B, L, K).astype(jnp.float32)                # (B, L, K)

    out = pl.pallas_call(
        patch_embed_kernel,
        out_shape=jax.ShapeDtypeStruct((B, L + 1, F), jnp.float32),
        grid=(B,),
        in_specs=[
            pl.BlockSpec((1, L, K), lambda b: (b, 0, 0)),   # x: per-batch tile
            pl.BlockSpec((K, F), lambda b: (0, 0)),         # w: invariant
            pl.BlockSpec((L, F), lambda b: (0, 0)),         # pos[1:]+bias: invariant
            pl.BlockSpec((1, F), lambda b: (0, 0)),         # cls+pos[0]: invariant
        ],
        out_specs=pl.BlockSpec((1, L + 1, F), lambda b: (b, 0, 0)),
        compiler_params=pltpu.CompilerParams(
            dimension_semantics=("parallel",)),
    )(x3d, w_f32, pos_plus_b, cls_row)
    return out                                                      # (B, L+1, F)


def reference_forward(image, w, b, cls_token, positions):
    B, N, C, D, H, W = image.shape
    ncd = (N * C * D) // 3
    x2d = image.reshape(B, ncd, 3 * H * W).astype(jnp.float32)
    emb = jnp.einsum("blk,kf->blf", x2d, w) + b.reshape(1, 1, -1)
    cls = jnp.broadcast_to(cls_token.reshape(1, 1, -1), (B, 1, w.shape[1]))
    x = jnp.concatenate([cls, emb], axis=1)
    return x + positions[None, :, :]


if __name__ == "__main__":
    # Small shapes consistent with the module:
    #   patch_size=1, n_modalities=2, per-modality channels=1, depth=6 (div by 3)
    #   => L = n_modalities * depth / num_channels = 4, positions has L+1 rows.
    B, N, C, D, H, W = 2, 2, 1, 6, 16, 16
    EMB = 32                       # emb_size (final_feat_dim, no clinical data)
    L = (N * C * D) // 3           # 4
    K = 3 * H * W                  # 768

    key = jax.random.PRNGKey(0)
    k_img, k_w, k_b, k_cls, k_pos = jax.random.split(key, 5)

    image = jax.random.normal(k_img, (B, N, C, D, H, W), dtype=jnp.float32)
    w = jax.random.normal(k_w, (K, EMB), dtype=jnp.float32) * 0.02   # backbone fc stand-in
    b = jax.random.normal(k_b, (EMB,), dtype=jnp.float32) * 0.02
    cls_token = jax.random.normal(k_cls, (1, 1, EMB), dtype=jnp.float32)
    positions = jax.random.normal(k_pos, (L + 1, EMB), dtype=jnp.float32)

    # Init-time parameter packing (done once, outside the forward path).
    w_f32, pos_plus_b, cls_row = prepare_patch_embed_params(w, b, cls_token, positions)
    w_f32 = jax.block_until_ready(w_f32)

    out = patch_embedding_forward(image, w_f32, pos_plus_b, cls_row)
    out = jax.block_until_ready(out)

    ref = reference_forward(image, w, b, cls_token, positions)
    assert out.shape == (B, L + 1, EMB), out.shape
    assert jnp.allclose(out, ref, atol=1e-4, rtol=1e-4), "mismatch vs reference"

    print("KERNEL_OK")
</pallas_src>

<mosaic_0001>
module attributes {stable_mosaic.version = 11 : i64} {
  func.func @patch_embed_kernel(%arg0: i32, %arg1: memref<1x4x768xf32, #tpu.memory_space<vmem>>, %arg2: memref<768x32xf32, #tpu.memory_space<vmem>>, %arg3: memref<4x32xf32, #tpu.memory_space<vmem>>, %arg4: memref<1x32xf32, #tpu.memory_space<vmem>>, %arg5: memref<1x5x32xf32, #tpu.memory_space<vmem>>) attributes {dimension_semantics = [#tpu.dimension_semantics<parallel>], iteration_bounds = array<i64: 2>, scalar_prefetch = 0 : i64, scratch_operands = 0 : i64, tpu.core_type = #tpu.core_type<tc>, window_params = [{transform_indices = @transform_0, window_bounds = array<i64: 1, 4, 768>}, {pipeline_mode = #tpu.pipeline_mode<synchronous>, transform_indices = @transform_1, window_bounds = array<i64: 768, 32>}, {pipeline_mode = #tpu.pipeline_mode<synchronous>, transform_indices = @transform_2, window_bounds = array<i64: 4, 32>}, {pipeline_mode = #tpu.pipeline_mode<synchronous>, transform_indices = @transform_3, window_bounds = array<i64: 1, 32>}, {transform_indices = @transform_4, window_bounds = array<i64: 1, 5, 32>}]} {
    %c0 = arith.constant 0 : index
    %c0_0 = arith.constant 0 : index
    %c0_1 = arith.constant 0 : index
    %0 = vector.load %arg1[%c0, %c0_0, %c0_1] : memref<1x4x768xf32, #tpu.memory_space<vmem>>, vector<1x4x768xf32>
    %1 = vector.shape_cast %0 : vector<1x4x768xf32> to vector<4x768xf32>
    %c0_2 = arith.constant 0 : index
    %c0_3 = arith.constant 0 : index
    %2 = vector.load %arg2[%c0_2, %c0_3] : memref<768x32xf32, #tpu.memory_space<vmem>>, vector<768x32xf32>
    %cst = arith.constant dense<0.000000e+00> : vector<4x32xf32>
    %3 = tpu.matmul %1, %2, %cst {dimension_numbers = #tpu.dot_dimension_numbers<[1], [0], [0], [1], [0, 0, 1, 1], [], []>} : vector<4x768xf32>, vector<768x32xf32>, vector<4x32xf32> -> vector<4x32xf32>
    %c0_4 = arith.constant 0 : index
    %c0_5 = arith.constant 0 : index
    %4 = vector.load %arg4[%c0_4, %c0_5] : memref<1x32xf32, #tpu.memory_space<vmem>>, vector<1x32xf32>
    %c0_6 = arith.constant 0 : index
    %c0_7 = arith.constant 0 : index
    %c0_8 = arith.constant 0 : index
    %5 = vector.load %arg5[%c0_6, %c0_7, %c0_8] : memref<1x5x32xf32, #tpu.memory_space<vmem>>, vector<1x1x32xf32>
    %6 = vector.shape_cast %5 : vector<1x1x32xf32> to vector<1x32xf32>
    %7 = vector.shape_cast %4 : vector<1x32xf32> to vector<1x1x32xf32>
    tpu.vector_store %arg5[%c0_6, %c0_7, %c0_8], %7 {strides = array<i32>} : memref<1x5x32xf32, #tpu.memory_space<vmem>>, vector<1x1x32xf32>,
    %c0_9 = arith.constant 0 : index
    %c0_10 = arith.constant 0 : index
    %8 = vector.load %arg3[%c0_9, %c0_10] : memref<4x32xf32, #tpu.memory_space<vmem>>, vector<4x32xf32>
    %9 = arith.addf %3, %8 : vector<4x32xf32>
    %c0_11 = arith.constant 0 : index
    %c1 = arith.constant 1 : index
    %c0_12 = arith.constant 0 : index
    %10 = vector.load %arg5[%c0_11, %c1, %c0_12] : memref<1x5x32xf32, #tpu.memory_space<vmem>>, vector<1x4x32xf32>
    %11 = vector.shape_cast %10 : vector<1x4x32xf32> to vector<4x32xf32>
    %12 = vector.shape_cast %9 : vector<4x32xf32> to vector<1x4x32xf32>
    tpu.vector_store %arg5[%c0_11, %c1, %c0_12], %12 {strides = array<i32>} : memref<1x5x32xf32, #tpu.memory_space<vmem>>, vector<1x4x32xf32>,
    return
  }
  func.func @transform_0(%arg0: i32) -> (i32, i32, i32) {
    %c0_i32 = arith.constant 0 : i32
    %c0_i32_0 = arith.constant 0 : i32
    %c0_i32_1 = arith.constant 0 : i32
    return %arg0, %c0_i32, %c0_i32_0 : i32, i32, i32
  }
  func.func @transform_1(%arg0: i32) -> (i32, i32) {
    %c0_i32 = arith.constant 0 : i32
    %c0_i32_0 = arith.constant 0 : i32
    %c0_i32_1 = arith.constant 0 : i32
    return %c0_i32, %c0_i32_0 : i32, i32
  }
  func.func @transform_2(%arg0: i32) -> (i32, i32) {
    %c0_i32 = arith.constant 0 : i32
    %c0_i32_0 = arith.constant 0 : i32
    %c0_i32_1 = arith.constant 0 : i32
    return %c0_i32, %c0_i32_0 : i32, i32
  }
  func.func @transform_3(%arg0: i32) -> (i32, i32) {
    %c0_i32 = arith.constant 0 : i32
    %c0_i32_0 = arith.constant 0 : i32
    %c0_i32_1 = arith.constant 0 : i32
    return %c0_i32, %c0_i32_0 : i32, i32
  }
  func.func @transform_4(%arg0: i32) -> (i32, i32, i32) {
    %c0_i32 = arith.constant 0 : i32
    %c0_i32_0 = arith.constant 0 : i32
    %c0_i32_1 = arith.constant 0 : i32
    return %arg0, %c0_i32, %c0_i32_0 : i32, i32, i32
  }
}

</mosaic_0001>

<bundles_post_ra>
// kernel: tpu_custom_call.1
= control target key start
LH: loop header
LB: loop body
LE: loop exit
PB: predicated region body
PF: predicated region fallthrough
CT: control target
= control target key end

     0   :  { %s545_s15 = smov 0   ;;  %s875_s0 = inlined_call_operand.vmem [shape: f32[2,4,768], index: 0, kind: input, shape index: {}]   ;;  %s876_s1 = inlined_call_operand.vmem [shape: f32[768,32], index: 1, kind: input, shape index: {}]   ;;  %s877_s2 = inlined_call_operand.vmem [shape: f32[4,32], index: 2, kind: input, shape index: {}]   ;;  %s878_s3 = inlined_call_operand.vmem [shape: f32[1,32], index: 3, kind: input, shape index: {}]   ;;  %s879_s4 = inlined_call_operand.vmem [shape: f32[2,5,32], index: 4, kind: output, shape index: {}]  }
   0x1 LB: > { %s494_s16 = sadd.s32 4294967295, %s518_s15   ;;  %p498_p0 = scmp.ge.s32.totalorder %s518_s15, 1  ;;  %s518_s15 = sphi %s545_s15, %s14_s15  }
   0x2   : > { %p162_p1 = scmp.lt.s32.totalorder %s518_s15, 3 }
   0x4   : > { %p163_p2 = pnand %p498_p0, %p162_p1 }
   0x5   : > { %p630_p3 = scmp.lt.s32.totalorder (!%p163_p2), %s494_s16, 1 }
   0x6   : > { %166 = sbr.rel (%p163_p2) target bundleno = 206 (0xce), region = 36 }
   0xb   : > { %v214_v0 = vld [vmem:[%s876_s1 + $0x78] sm:$0xff]  ;;  %v213_v1 = vld [vmem:[%s876_s1 + $0x70] sm:$0xff]  ;;  %v212_v4 = vld [vmem:[%s876_s1 + $0x68] sm:$0xff]  ;;  %s882_s16 = smov (!%p630_p3, %s494_s16), 1  ;;  %vm296_vm0 = vcmask 253952   ;;  %vm439_vm1 = vcmask 257024  }
   0xc   : > { %v230_v2 = vld [vmem:[%s876_s1 + $0xf8] sm:$0xff]  ;;  %319 = vmatpush.msra.mxu0 %v214_v0  ;;  %v229_v3 = vld [vmem:[%s876_s1 + $0xf0] sm:$0xff]  ;;  %v228_v5 = vld [vmem:[%s876_s1 + $0xe8] sm:$0xff]  ;;  %s503_s28 = smul.u32 24, %s882_s16  ;;  %s500_s22 = sshll.u32 %s882_s16, 3 }
   0xd   : > { %339 = vmatpush.msra.mxu1 %v230_v2  ;;  %v211_v6 = vld [vmem:[%s876_s1 + $0x60] sm:$0xff]  ;;  %v210_v8 = vld [vmem:[%s876_s1 + $0x58] sm:$0xff]  ;;  %v209_v10 = vld [vmem:[%s876_s1 + $0x50] sm:$0xff]  ;;  %s195_s26 = scalar_lea.vmem %s879_s4, %s500_s22 }
   0xe   : > { %320 = vmatpush.msra.mxu0 %v213_v1  ;;  %v227_v7 = vld [vmem:[%s876_s1 + $0xe0] sm:$0xff]  ;;  %v226_v9 = vld [vmem:[%s876_s1 + $0xd8] sm:$0xff]  ;;  %v225_v12 = vld [vmem:[%s876_s1 + $0xd0] sm:$0xff]  ;;  %s716_s23 = scalar_lea.vmem %s875_s0, %s503_s28 }
   0xf   : > { %340 = vmatpush.msra.mxu1 %v229_v3  ;;  %v246_v11 = vld [vmem:[%s876_s1 + $0x178] sm:$0xff]  ;;  %v245_v13 = vld [vmem:[%s876_s1 + $0x170] sm:$0xff]  ;;  %v244_v15 = vld [vmem:[%s876_s1 + $0x168] sm:$0xff] }
  0x10   : > { %321 = vmatpush.msra.mxu0 %v212_v4  ;;  %359 = vmatpush.msra.mxu2 %v246_v11  ;;  %v262_v14 = vld [vmem:[%s876_s1 + $0x1f8] sm:$0xff]  ;;  %v261_v16 = vld [vmem:[%s876_s1 + $0x1f0] sm:$0xff]  ;;  %v208_v17 = vld [vmem:[%s876_s1 + $0x48] sm:$0xff] }
  0x11   : > { %341 = vmatpush.msra.mxu1 %v228_v5  ;;  %v224_v18 = vld [vmem:[%s876_s1 + $0xc8] sm:$0xff]  ;;  %379 = vmatpush.msra.mxu3 %v262_v14  ;;  %v243_v19 = vld [vmem:[%s876_s1 + $0x160] sm:$0xff]  ;;  %v242_v23 = vld [vmem:[%s876_s1 + $0x158] sm:$0xff] }
  0x12   : > { %322 = vmatpush.msra.mxu0 %v211_v6  ;;  %360 = vmatpush.msra.mxu2 %v245_v13  ;;  %v260_v20 = vld [vmem:[%s876_s1 + $0x1e8] sm:$0xff]  ;;  %v207_v21 = vld [vmem:[%s876_s1 + $0x40] sm:$0xff]  ;;  %v206_v25 = vld [vmem:[%s876_s1 + $0x38] sm:$0xff] }
  0x13   : > { %342 = vmatpush.msra.mxu1 %v227_v7  ;;  %v223_v22 = vld [vmem:[%s876_s1 + $0xc0] sm:$0xff]  ;;  %380 = vmatpush.msra.mxu3 %v261_v16  ;;  %v222_v26 = vld [vmem:[%s876_s1 + $0xb8] sm:$0xff]  ;;  %v241_v27 = vld [vmem:[%s876_s1 + $0x150] sm:$0xff] }
  0x14   : > { %323 = vmatpush.msra.mxu0 %v210_v8  ;;  %361 = vmatpush.msra.mxu2 %v244_v15  ;;  %v259_v24 = vld [vmem:[%s876_s1 + $0x1e0] sm:$0xff]  ;;  %v258_v28 = vld [vmem:[%s876_s1 + $0x1d8] sm:$0xff]  ;;  %v205_v29 = vld [vmem:[%s876_s1 + $0x30] sm:$0xff] }
  0x15   : > { %343 = vmatpush.msra.mxu1 %v226_v9  ;;  %381 = vmatpush.msra.mxu3 %v260_v20  ;;  %v221_v30 = vld [vmem:[%s876_s1 + $0xb0] sm:$0xff]  ;;  %v240_v31 = vld [vmem:[%s876_s1 + $0x148] sm:$0xff]  ;;  %v239_v35 = vld [vmem:[%s876_s1 + $0x140] sm:$0xff] }
  0x16   : > { %324 = vmatpush.msra.mxu0 %v209_v10  ;;  %362 = vmatpush.msra.mxu2 %v243_v19  ;;  %v257_v32 = vld [vmem:[%s876_s1 + $0x1d0] sm:$0xff]  ;;  %v204_v33 = vld [vmem:[%s876_s1 + $0x28] sm:$0xff]  ;;  %v203_v37 = vld [vmem:[%s876_s1 + $0x20] sm:$0xff] }
  0x17   : > { %344 = vmatpush.msra.mxu1 %v225_v12  ;;  %382 = vmatpush.msra.mxu3 %v259_v24  ;;  %v220_v34 = vld [vmem:[%s876_s1 + $0xa8] sm:$0xff]  ;;  %v219_v38 = vld [vmem:[%s876_s1 + $0xa0] sm:$0xff]  ;;  %v238_v39 = vld [vmem:[%s876_s1 + $0x138] sm:$0xff] }
  0x18   : > { %325 = vmatpush.msra.mxu0 %v208_v17  ;;  %363 = vmatpush.msra.mxu2 %v242_v23  ;;  %v256_v36 = vld [vmem:[%s876_s1 + $0x1c8] sm:$0xff]  ;;  %v255_v40 = vld [vmem:[%s876_s1 + $0x1c0] sm:$0xff]  ;;  %v202_v41 = vld [vmem:[%s876_s1 + $0x18] sm:$0xff] }
  0x19   : > { %345 = vmatpush.msra.mxu1 %v224_v18  ;;  %383 = vmatpush.msra.mxu3 %v258_v28  ;;  %v218_v42 = vld [vmem:[%s876_s1 + $0x98] sm:$0xff]  ;;  %v237_v43 = vld [vmem:[%s876_s1 + $0x130] sm:$0xff]  ;;  %v236_v47 = vld [vmem:[%s876_s1 + $0x128] sm:$0xff] }
  0x1a   : > { %326 = vmatpush.msra.mxu0 %v207_v21  ;;  %364 = vmatpush.msra.mxu2 %v241_v27  ;;  %v254_v44 = vld [vmem:[%s876_s1 + $0x1b8] sm:$0xff]  ;;  %v201_v45 = vld [vmem:[%s876_s1 + $0x10] sm:$0xff]  ;;  %v200_v49 = vld [vmem:[%s876_s1 + $0x8] sm:$0xff] }
  0x1b   : > { %346 = vmatpush.msra.mxu1 %v223_v22  ;;  %384 = vmatpush.msra.mxu3 %v257_v32  ;;  %v217_v46 = vld [vmem:[%s876_s1 + $0x90] sm:$0xff]  ;;  %v216_v50 = vld [vmem:[%s876_s1 + $0x88] sm:$0xff]  ;;  %v235_v51 = vld [vmem:[%s876_s1 + $0x120] sm:$0xff] }
  0x1c   : > { %327 = vmatpush.msra.mxu0 %v206_v25  ;;  %365 = vmatpush.msra.mxu2 %v240_v31  ;;  %v253_v48 = vld [vmem:[%s876_s1 + $0x1b0] sm:$0xff]  ;;  %v252_v52 = vld [vmem:[%s876_s1 + $0x1a8] sm:$0xff]  ;;  %v199_v53 = vld [vmem:[%s876_s1] sm:$0xff] }
  0x1d   : > { %347 = vmatpush.msra.mxu1 %v222_v26  ;;  %385 = vmatpush.msra.mxu3 %v256_v36  ;;  %v215_v54 = vld [vmem:[%s876_s1 + $0x80] sm:$0xff]  ;;  %v197_v55 = vld [vmem:[%s716_s23 + $0x8] sm:$0xff]  ;;  %v278_v56 = vld [vmem:[%s876_s1 + $0x278] sm:$0xff] }
  0x1e   : > { %328 = vmatpush.msra.mxu0 %v205_v29  ;;  %366 = vmatpush.msra.mxu2 %v239_v35  ;;  %v294_v57 = vld [vmem:[%s876_s1 + $0x2f8] sm:$0xff]  ;;  %304 = vst [vmem:[#allocation1 + $0x10] ss:$2 sm:$0xff] %v197_v55  ;;  %v196_v58 = vld [vmem:[%s716_s23] sm:$0xff]  ;;  %v277_v61 = vld [vmem:[%s876_s1 + $0x270] sm:$0xff] }
  0x1f   : > { %348 = vmatpush.msra.mxu1 %v221_v30  ;;  %386 = vmatpush.msra.mxu3 %v255_v40  ;;  %v234_v59 = vld [vmem:[%s876_s1 + $0x118] sm:$0xff]  ;;  %v251_v60 = vld [vmem:[%s876_s1 + $0x1a0] sm:$0xff]  ;;  %302 = vst [vmem:[#allocation1] ss:$2 sm:$0xff] %v196_v58  ;;  %v293_v62 = vld [vmem:[%s876_s1 + $0x2f0] sm:$0xff] }
  0x20   : > { %329 = vmatpush.msra.mxu0 %v204_v33  ;;  %367 = vmatpush.msra.mxu2 %v238_v39  ;;  %v233_v63 = vld [vmem:[%s876_s1 + $0x110] sm:$0xff]  ;;  %v250_v0 = vld [vmem:[%s876_s1 + $0x198] sm:$0xff]  ;;  %v276_v2 = vld [vmem:[%s876_s1 + $0x268] sm:$0xff] }
  0x21   : > { %349 = vmatpush.msra.mxu1 %v220_v34  ;;  %387 = vmatpush.msra.mxu3 %v254_v44  ;;  %v198_v1 = vld [vmem:[%s716_s23 + $0x10] sm:$0xff]  ;;  %v292_v3 = vld [vmem:[%s876_s1 + $0x2e8] sm:$0xff]  ;;  %v275_v6 = vld [vmem:[%s876_s1 + $0x260] sm:$0xff] }
  0x22   : > { %330 = vmatpush.msra.mxu0 %v203_v37  ;;  %368 = vmatpush.msra.mxu2 %v237_v43  ;;  %306 = vst [vmem:[#allocation1 + $0x20] ss:$2 sm:$0xff] %v198_v1  ;;  %v232_v4 = vld [vmem:[%s876_s1 + $0x108] sm:$0xff]  ;;  %v249_v5 = vld [vmem:[%s876_s1 + $0x190] sm:$0xff]  ;;  %v291_v7 = vld [vmem:[%s876_s1 + $0x2e0] sm:$0xff] }
  0x23   : > { %350 = vmatpush.msra.mxu1 %v219_v38  ;;  %388 = vmatpush.msra.mxu3 %v253_v48  ;;  %v231_v8 = vld [vmem:[%s876_s1 + $0x100] sm:$0xff]  ;;  %v248_v9 = vld [vmem:[%s876_s1 + $0x188] sm:$0xff]  ;;  %v274_v10 = vld [vmem:[%s876_s1 + $0x258] sm:$0xff] }
  0x24   : > { %331 = vmatpush.msra.mxu0 %v202_v41  ;;  %369 = vmatpush.msra.mxu2 %v236_v47  ;;  %v290_v11 = vld [vmem:[%s876_s1 + $0x2d8] sm:$0xff]  ;;  %v247_v13 = vld [vmem:[%s876_s1 + $0x180] sm:$0xff]  ;;  %v273_v14 = vld [vmem:[%s876_s1 + $0x250] sm:$0xff] }
  0x25   : > { %351 = vmatpush.msra.mxu1 %v218_v42  ;;  %389 = vmatpush.msra.mxu3 %v252_v52  ;;  %v309_v12 = vld.sshfl [vmem:[#allocation1 + $0x10] sm:$0xff pattern:$0x75316420]  ;;  %v310_v17 = vld.sshfl [vmem:[#allocation1 + $0x18] sm:$0xff pattern:$0x75316420] }
  0x26   : > { %332 = vmatpush.msra.mxu0 %v201_v45  ;;  %370 = vmatpush.msra.mxu2 %v235_v51  ;;  %v289_v15 = vld [vmem:[%s876_s1 + $0x2d0] sm:$0xff]  ;;  %v307_v16 = vld.sshfl [vmem:[#allocation1] sm:$0xff pattern:$0x75316420]  ;;  %v272_v18 = vld [vmem:[%s876_s1 + $0x248] sm:$0xff] }
  0x27   : > { %352 = vmatpush.msra.mxu1 %v217_v46  ;;  %390 = vmatpush.msra.mxu3 %v251_v60  ;;  %v288_v19 = vld [vmem:[%s876_s1 + $0x2c8] sm:$0xff]  ;;  %v271_v21 = vld [vmem:[%s876_s1 + $0x240] sm:$0xff]  ;;  %v270_v23 = vld [vmem:[%s876_s1 + $0x238] sm:$0xff] }
  0x28   : > { %333 = vmatpush.msra.mxu0 %v200_v49  ;;  %371 = vmatpush.msra.mxu2 %v234_v59  ;;  %v308_v20 = vld.sshfl [vmem:[#allocation1 + $0x8] sm:$0xff pattern:$0x75316420]  ;;  %v287_v22 = vld [vmem:[%s876_s1 + $0x2c0] sm:$0xff]  ;;  %v286_v24 = vld [vmem:[%s876_s1 + $0x2b8] sm:$0xff] }
  0x29   : > { %353 = vmatpush.msra.mxu1 %v216_v50  ;;  %391 = vmatpush.msra.mxu3 %v250_v0  ;;  %v269_v25 = vld [vmem:[%s876_s1 + $0x230] sm:$0xff]  ;;  %v268_v27 = vld [vmem:[%s876_s1 + $0x228] sm:$0xff]  ;;  %v267_v29 = vld [vmem:[%s876_s1 + $0x220] sm:$0xff] }
  0x2a   : > { %334 = vmatpush.msra.mxu0 %v199_v53  ;;  %372 = vmatpush.msra.mxu2 %v233_v63  ;;  %v285_v26 = vld [vmem:[%s876_s1 + $0x2b0] sm:$0xff]  ;;  %v284_v28 = vld [vmem:[%s876_s1 + $0x2a8] sm:$0xff]  ;;  %v283_v30 = vld [vmem:[%s876_s1 + $0x2a0] sm:$0xff] }
  0x2b   : > { %354 = vmatpush.msra.mxu1 %v215_v54  ;;  %392 = vmatpush.msra.mxu3 %v249_v5  ;;  %v266_v31 = vld [vmem:[%s876_s1 + $0x218] sm:$0xff]  ;;  %v265_v33 = vld [vmem:[%s876_s1 + $0x210] sm:$0xff]  ;;  %v264_v35 = vld [vmem:[%s876_s1 + $0x208] sm:$0xff] }
  0x2c   : > { %399 = vmatpush.msrb.mxu0 %v278_v56  ;;  %373 = vmatpush.msra.mxu2 %v232_v4  ;;  %v282_v32 = vld [vmem:[%s876_s1 + $0x298] sm:$0xff]  ;;  %v281_v34 = vld [vmem:[%s876_s1 + $0x290] sm:$0xff]  ;;  %v280_v36 = vld [vmem:[%s876_s1 + $0x288] sm:$0xff] }
  0x2d   : > { %419 = vmatpush.msrb.mxu1 %v294_v57  ;;  %393 = vmatpush.msra.mxu3 %v248_v9  ;;  %v263_v37 = vld [vmem:[%s876_s1 + $0x200] sm:$0xff]  ;;  %v312_v40 = vld.sshfl [vmem:[#allocation1 + $0x28] sm:$0xff pattern:$0x75316420] }
  0x2e   : > { %400 = vmatpush.msrb.mxu0 %v277_v61  ;;  %374 = vmatpush.msra.mxu2 %v231_v8  ;;  %v279_v38 = vld [vmem:[%s876_s1 + $0x280] sm:$0xff] }
  0x2f   : > { %420 = vmatpush.msrb.mxu1 %v293_v62  ;;  %375 = vmatmul.f32.vlgmr.msra.gmra.mxu2 %v309_v12  ;;  %v311_v39 = vld.sshfl [vmem:[#allocation1 + $0x20] sm:$0xff pattern:$0x75316420] }
  0x30   : > { %401 = vmatpush.msrb.mxu0 %v276_v2  ;;  %394 = vmatpush.msra.mxu3 %v247_v13  ;;  %v295_v41 = vld [vmem:[%s878_s3] sm:$0x1] }
  0x31   : > { %421 = vmatpush.msrb.mxu1 %v292_v3  ;;  %335 = vmatmul.f32.vlgmr.msra.gmra.mxu0 %v307_v16  ;;  %297 = vst.msk [vmem:[%s195_s26] sm:$0x1] %vm296_vm0, %v295_v41  ;;  %v298_v42 = vld [vmem:[%s877_s2] sm:$0xf] }
  0x32   : > { %402 = vmatpush.msrb.mxu0 %v275_v6  ;;  %395 = vmatmul.f32.vlgmr.msra.gmra.mxu3 %v310_v17 }
  0x33   : > { %422 = vmatpush.msrb.mxu1 %v291_v7 }
  0x34   : > { %403 = vmatpush.msrb.mxu0 %v274_v10  ;;  %355 = vmatmul.f32.vlgmr.msra.gmra.mxu1 %v308_v20 }
  0x35   : > { %423 = vmatpush.msrb.mxu1 %v290_v11 }
  0x36   : > { %404 = vmatpush.msrb.mxu0 %v273_v14 }
  0x37   : > { %424 = vmatpush.msrb.mxu1 %v289_v15 }
  0x38   : > { %405 = vmatpush.msrb.mxu0 %v272_v18 }
  0x39   : > { %425 = vmatpush.msrb.mxu1 %v288_v19 }
  0x3a   : > { %406 = vmatpush.msrb.mxu0 %v271_v21 }
  0x3b   : > { %426 = vmatpush.msrb.mxu1 %v287_v22 }
  0x3c   : > { %407 = vmatpush.msrb.mxu0 %v270_v23 }
  0x3d   : > { %427 = vmatpush.msrb.mxu1 %v286_v24 }
  0x3e   : > { %408 = vmatpush.msrb.mxu0 %v269_v25 }
  0x3f   : > { %428 = vmatpush.msrb.mxu1 %v285_v26 }
  0x40   : > { %409 = vmatpush.msrb.mxu0 %v268_v27 }
  0x41   : > { %429 = vmatpush.msrb.mxu1 %v284_v28 }
  0x42   : > { %410 = vmatpush.msrb.mxu0 %v267_v29 }
  0x43   : > { %430 = vmatpush.msrb.mxu1 %v283_v30 }
  0x44   : > { %411 = vmatpush.msrb.mxu0 %v266_v31 }
  0x45   : > { %431 = vmatpush.msrb.mxu1 %v282_v32 }
  0x46   : > { %412 = vmatpush.msrb.mxu0 %v265_v33 }
  0x47   : > { %432 = vmatpush.msrb.mxu1 %v281_v34 }
  0x48   : > { %413 = vmatpush.msrb.mxu0 %v264_v35 }
  0x49   : > { %433 = vmatpush.msrb.mxu1 %v280_v36 }
  0x4a   : > { %414 = vmatpush.msrb.mxu0 %v263_v37 }
  0x4b   : > { %434 = vmatpush.msrb.mxu1 %v279_v38  ;;  %415 = vmatmul.f32.vlgmr.msrb.gmra.mxu0 %v311_v39 }
  0x4c   : > { %435 = vmatmul.f32.vlgmr.msrb.gmra.mxu1 %v312_v40 }
  0xae   : > { %v336_v43 = vpop.f32.mrf.mxu0 }
  0xaf   : > { %v337_v44 = vadd.f32 %v336_v43, %v298_v42 }
  0xb1   : > { %v356_v45 = vpop.f32.mrf.mxu1 }
  0xb2   : > { %v357_v46 = vadd.f32 %v356_v45, %v337_v44  ;;  %v376_v47 = vpop.f32.mrf.mxu2 }
  0xb4   : > { %v377_v48 = vadd.f32 %v376_v47, %v357_v46 }
  0xb5   : > { %v396_v49 = vpop.f32.mrf.mxu3 }
  0xb6   : > { %v397_v50 = vadd.f32 %v396_v49, %v377_v48 }
  0xc8   : > { %v416_v51 = vpop.f32.mrf.mxu0 }
  0xc9   : > { %v436_v52 = vpop.f32.mrf.mxu1  ;;  %v417_v53 = vadd.f32 %v416_v51, %v397_v50 }
  0xcb   : > { %v437_v54 = vadd.f32 %v436_v52, %v417_v53 }
  0xcd   : > { %440 = vst.msk [vmem:[%s195_s26 + $0x1] sm:$0xf] %vm439_vm1, %v437_v54 }
  0xce PF: > { %s14_s15 = sadd.s32 1, %s518_s15  }
  0xcf   : > { %p11_p4 = scmp.ge.s32.totalorder %s14_s15, 4  }
  0xd1   :  { %13 = sbr.rel (!%p11_p4) target bundleno = 1 (0x1), region = 68 }

</bundles_post_ra>
